<compile_context>
chip_gen: v5e
topology: v5e:2x2
jax: 0.10.0
libtpu: 0.0.40
codegen_flags: <defaults>
</compile_context>

<pallas_src>
import jax
import jax.numpy as jnp
from jax import lax
from jax.experimental import pallas as pl
from jax.experimental.pallas import tpu as pltpu

EPSILON = float(jnp.finfo(jnp.float32).eps)

# Contract on dim 1 of both operands: a @ b.T  -> (rows_a, rows_b)
_DN_TRANS_B = (((1,), (1,)), ((), ()))


def _unsuper_layer_kernel(reg_ref, y_ref, x_ref, w1_ref, w2_ref, o_ref):
    """One batch tile of the multiplicative update.

    reg_ref : SMEM (2,) f32  -> [l_1, l_2]
    y_ref   : VMEM (tb, comp)
    x_ref   : VMEM (tb, features)
    w1_ref  : VMEM (comp, comp)      -- fc1.weight, PyTorch (out, in) layout
    w2_ref  : VMEM (comp, features)  -- fc2.weight, PyTorch (out, in) layout
    o_ref   : VMEM (tb, comp)
    """
    l_1 = reg_ref[0]
    l_2 = reg_ref[1]

    y_in = y_ref[...]                      # native dtype for the MXU
    x_in = x_ref[...]

    # fc1(y) = y @ W1.T and fc2(x) = x @ W2.T, both on the MXU with f32 accum.
    fc1 = lax.dot_general(y_in, w1_ref[...], _DN_TRANS_B,
                          preferred_element_type=jnp.float32)
    numerator = lax.dot_general(x_in, w2_ref[...], _DN_TRANS_B,
                                preferred_element_type=jnp.float32)

    # Elementwise tail in f32 (safe on v5e which has no bf16 VPU/EUP path).
    y = y_in.astype(jnp.float32)
    denominator = fc1 + l_2 * y + (l_1 + EPSILON)

    # EUP approx reciprocal + one Newton refinement -> ~f32 accuracy, frees VPU.
    r = pl.reciprocal(denominator, approx=True)
    r = r * (2.0 - denominator * r)

    o_ref[...] = (numerator * r * y).astype(o_ref.dtype)


def _auto_tile_rows(B, bytes_per_row, resident_bytes, vmem_budget=26 * 1024 * 1024):
    """Largest batch tile (multiple of 8, dividing B) that keeps double-buffered
    y/x/out blocks + resident weights under `vmem_budget`, preferring >= 2 grid
    steps (pipelining + v7x megacore) and the measured 512-2048-row sweet spot."""
    if B <= 512 or B % 8 != 0:
        return B                                   # tiny/awkward batch: one block
    max_rows = max(8, (vmem_budget - resident_bytes) // max(bytes_per_row, 1))
    target = int(min(max_rows, 2048, B // 2))      # at least 2 grid steps
    target = max(8, (target // 8) * 8)
    tb = target
    while tb > 8 and B % tb != 0:
        tb -= 8
    return tb if B % tb == 0 else B


def unsuper_layer(y, x, w1, w2, l_1, l_2, *, tb=None):
    """Pallas implementation of UnsuperLayer.forward.

    y : (B, comp)        x : (B, features)
    w1: (comp, comp)     w2: (comp, features)   (PyTorch Linear weight layout)
    """
    B, comp = y.shape
    Bx, features = x.shape
    assert Bx == B
    assert w1.shape == (comp, comp)
    assert w2.shape == (comp, features)

    y_b = jnp.dtype(y.dtype).itemsize
    x_b = jnp.dtype(x.dtype).itemsize
    w_b = jnp.dtype(w1.dtype).itemsize

    # Double-buffered per-row bytes (y + x blocks in, out block back).
    bytes_per_row = 2 * (comp * y_b + features * x_b + comp * y_b)
    # Resident weights (counted 2x: Pallas may still double-buffer them).
    resident_bytes = 2 * (comp * comp + comp * features) * w_b

    if tb is None:
        tb = _auto_tile_rows(B, bytes_per_row, resident_bytes)
    assert B % tb == 0, "batch tile must divide the batch"

    # Size the scoped VMEM limit to the actual footprint (+ margin); the auto
    # tile budget keeps this comfortably under v7x's 64 MiB physical VMEM.
    need = tb * bytes_per_row + resident_bytes + (2 << 20)
    vmem_limit = int(max(need, 32 << 20))

    reg = jnp.asarray([l_1, l_2], dtype=jnp.float32)   # SMEM scalars, no recompile

    flops = 2 * B * comp * (comp + features) + 6 * B * comp
    bytes_accessed = (B * comp * y_b            # y in
                      + B * features * x_b      # x in
                      + B * comp * y_b          # out
                      + (comp * comp + comp * features) * w_b
                      + reg.size * 4)
    cost = pl.CostEstimate(flops=flops,
                           transcendentals=B * comp,
                           bytes_accessed=bytes_accessed)

    return pl.pallas_call(
        _unsuper_layer_kernel,
        out_shape=jax.ShapeDtypeStruct((B, comp), y.dtype),
        grid_spec=pltpu.PrefetchScalarGridSpec(
            num_scalar_prefetch=0,
            grid=(B // tb,),
            in_specs=[
                pl.BlockSpec(memory_space=pltpu.MemorySpace.SMEM),   # [l_1, l_2]
                pl.BlockSpec((tb, comp), lambda i: (i, 0)),          # y block
                pl.BlockSpec((tb, features), lambda i: (i, 0)),      # x block
                pl.BlockSpec((comp, comp), lambda i: (0, 0)),        # W1 (resident)
                pl.BlockSpec((comp, features), lambda i: (0, 0)),    # W2 (resident)
            ],
            out_specs=pl.BlockSpec((tb, comp), lambda i: (i, 0)),
        ),
        compiler_params=pltpu.CompilerParams(
            dimension_semantics=("parallel",),        # megacore-shard batch tiles
            vmem_limit_bytes=vmem_limit,
        ),
        cost_estimate=cost,
    )(reg, y, x, w1, w2)


def unsuper_layer_ref(y, x, w1, w2, l_1, l_2):
    denominator = y @ w1.T + l_2 * y + l_1 + EPSILON
    numerator = x @ w2.T
    return (numerator / denominator) * y


if __name__ == "__main__":
    l_1, l_2 = 0.1, 0.2
    key = jax.random.PRNGKey(0)

    def make_inputs(key, B, comp, features):
        k_y, k_x, k_w1, k_w2 = jax.random.split(key, 4)
        # NMF-style nonnegative inputs / weights keep the denominator positive.
        y = jax.random.uniform(k_y, (B, comp), dtype=jnp.float32) + 0.1
        x = jax.random.uniform(k_x, (B, features), dtype=jnp.float32) + 0.1
        w1 = jax.random.uniform(k_w1, (comp, comp), dtype=jnp.float32,
                                minval=0.0, maxval=1.0 / comp)
        w2 = jax.random.uniform(k_w2, (comp, features), dtype=jnp.float32,
                                minval=0.0, maxval=1.0 / features)
        return y, x, w1, w2

    # Small shapes consistent with the module: batch=8, comp=32, features=64.
    y, x, w1, w2 = make_inputs(key, 8, 32, 64)
    out = jax.block_until_ready(unsuper_layer(y, x, w1, w2, l_1, l_2))
    ref = unsuper_layer_ref(y, x, w1, w2, l_1, l_2)
    assert out.shape == (8, 32)
    assert jnp.allclose(out, ref, rtol=1e-5, atol=1e-5), "mismatch vs reference (small)"

    # Larger batch to exercise the tiled / pipelined / megacore path (grid > 1).
    k2 = jax.random.PRNGKey(1)
    y2, x2, w12, w22 = make_inputs(k2, 2048, 32, 64)
    out2 = jax.block_until_ready(unsuper_layer(y2, x2, w12, w22, l_1, l_2))
    ref2 = unsuper_layer_ref(y2, x2, w12, w22, l_1, l_2)
    assert out2.shape == (2048, 32)
    assert jnp.allclose(out2, ref2, rtol=1e-5, atol=1e-5), "mismatch vs reference (tiled)"

    print("KERNEL_OK")
</pallas_src>

<mosaic_0001>
module attributes {stable_mosaic.version = 11 : i64} {
  func.func @_unsuper_layer_kernel(%arg0: i32, %arg1: memref<2xf32, #tpu.memory_space<smem>>, %arg2: memref<8x32xf32, #tpu.memory_space<vmem>>, %arg3: memref<8x64xf32, #tpu.memory_space<vmem>>, %arg4: memref<32x32xf32, #tpu.memory_space<vmem>>, %arg5: memref<32x64xf32, #tpu.memory_space<vmem>>, %arg6: memref<8x32xf32, #tpu.memory_space<vmem>>) attributes {dimension_semantics = [#tpu.dimension_semantics<parallel>], iteration_bounds = array<i64: 1>, scalar_prefetch = 0 : i64, scratch_operands = 0 : i64, tpu.core_type = #tpu.core_type<tc>, window_params = [{transform_indices = @transform_0, window_bounds = array<i64: 2>}, {transform_indices = @transform_1, window_bounds = array<i64: 8, 32>}, {transform_indices = @transform_2, window_bounds = array<i64: 8, 64>}, {pipeline_mode = #tpu.pipeline_mode<synchronous>, transform_indices = @transform_3, window_bounds = array<i64: 32, 32>}, {pipeline_mode = #tpu.pipeline_mode<synchronous>, transform_indices = @transform_4, window_bounds = array<i64: 32, 64>}, {transform_indices = @transform_5, window_bounds = array<i64: 8, 32>}]} {
    %c0 = arith.constant 0 : index
    %0 = memref.load %arg1[%c0] : memref<2xf32, #tpu.memory_space<smem>>
    %c1 = arith.constant 1 : index
    %1 = memref.load %arg1[%c1] : memref<2xf32, #tpu.memory_space<smem>>
    %c0_0 = arith.constant 0 : index
    %c0_1 = arith.constant 0 : index
    %2 = vector.load %arg2[%c0_0, %c0_1] : memref<8x32xf32, #tpu.memory_space<vmem>>, vector<8x32xf32>
    %c0_2 = arith.constant 0 : index
    %c0_3 = arith.constant 0 : index
    %3 = vector.load %arg3[%c0_2, %c0_3] : memref<8x64xf32, #tpu.memory_space<vmem>>, vector<8x64xf32>
    %c0_4 = arith.constant 0 : index
    %c0_5 = arith.constant 0 : index
    %4 = vector.load %arg4[%c0_4, %c0_5] : memref<32x32xf32, #tpu.memory_space<vmem>>, vector<32x32xf32>
    %cst = arith.constant dense<0.000000e+00> : vector<8x32xf32>
    %5 = tpu.matmul %2, %4, %cst {dimension_numbers = #tpu.dot_dimension_numbers<[1], [1], [0], [0], [0, 0, 1, 0], [], []>} : vector<8x32xf32>, vector<32x32xf32>, vector<8x32xf32> -> vector<8x32xf32>
    %c0_6 = arith.constant 0 : index
    %c0_7 = arith.constant 0 : index
    %6 = vector.load %arg5[%c0_6, %c0_7] : memref<32x64xf32, #tpu.memory_space<vmem>>, vector<32x64xf32>
    %cst_8 = arith.constant dense<0.000000e+00> : vector<8x32xf32>
    %7 = tpu.matmul %3, %6, %cst_8 {dimension_numbers = #tpu.dot_dimension_numbers<[1], [1], [0], [0], [0, 0, 1, 0], [], []>} : vector<8x64xf32>, vector<32x64xf32>, vector<8x32xf32> -> vector<8x32xf32>
    %8 = vector.broadcast %1 : f32 to vector<8x32xf32>
    %9 = arith.mulf %8, %2 : vector<8x32xf32>
    %10 = arith.addf %5, %9 : vector<8x32xf32>
    %cst_9 = arith.constant 1.1920929E-7 : f32
    %11 = arith.addf %0, %cst_9 : f32
    %12 = vector.broadcast %11 : f32 to vector<8x32xf32>
    %13 = arith.addf %10, %12 : vector<8x32xf32>
    %14 = tpu.reciprocal %13 {approx = true} : vector<8x32xf32> -> vector<8x32xf32>
    %15 = arith.mulf %13, %14 : vector<8x32xf32>
    %cst_10 = arith.constant 2.000000e+00 : f32
    %16 = vector.broadcast %cst_10 : f32 to vector<8x32xf32>
    %17 = arith.subf %16, %15 : vector<8x32xf32>
    %18 = arith.mulf %14, %17 : vector<8x32xf32>
    %19 = arith.mulf %7, %18 : vector<8x32xf32>
    %20 = arith.mulf %19, %2 : vector<8x32xf32>
    %c0_11 = arith.constant 0 : index
    %c0_12 = arith.constant 0 : index
    %21 = vector.load %arg6[%c0_11, %c0_12] : memref<8x32xf32, #tpu.memory_space<vmem>>, vector<8x32xf32>
    tpu.vector_store %arg6[%c0_11, %c0_12], %20 {strides = array<i32>} : memref<8x32xf32, #tpu.memory_space<vmem>>, vector<8x32xf32>,
    return
  }
  func.func @transform_0(%arg0: i32) -> i32 {
    %c0_i32 = arith.constant 0 : i32
    %c0_i32_0 = arith.constant 0 : i32
    return %c0_i32 : i32
  }
  func.func @transform_1(%arg0: i32) -> (i32, i32) {
    %c0_i32 = arith.constant 0 : i32
    %c0_i32_0 = arith.constant 0 : i32
    return %arg0, %c0_i32 : i32, i32
  }
  func.func @transform_2(%arg0: i32) -> (i32, i32) {
    %c0_i32 = arith.constant 0 : i32
    %c0_i32_0 = arith.constant 0 : i32
    return %arg0, %c0_i32 : i32, i32
  }
  func.func @transform_3(%arg0: i32) -> (i32, i32) {
    %c0_i32 = arith.constant 0 : i32
    %c0_i32_0 = arith.constant 0 : i32
    %c0_i32_1 = arith.constant 0 : i32
    return %c0_i32, %c0_i32_0 : i32, i32
  }
  func.func @transform_4(%arg0: i32) -> (i32, i32) {
    %c0_i32 = arith.constant 0 : i32
    %c0_i32_0 = arith.constant 0 : i32
    %c0_i32_1 = arith.constant 0 : i32
    return %c0_i32, %c0_i32_0 : i32, i32
  }
  func.func @transform_5(%arg0: i32) -> (i32, i32) {
    %c0_i32 = arith.constant 0 : i32
    %c0_i32_0 = arith.constant 0 : i32
    return %arg0, %c0_i32 : i32, i32
  }
}

</mosaic_0001>

<bundles_post_ra>
// kernel: tpu_custom_call.1
= control target key start
LH: loop header
LB: loop body
LE: loop exit
PB: predicated region body
PF: predicated region fallthrough
CT: control target
= control target key end

     0   :  { %10 = vsyncpa [#allocation5], 0  ;;  %s439_s0 = inlined_call_operand.hbm [shape: f32[2], index: 0, kind: input, shape index: {}]   ;;  %s440_s1 = inlined_call_operand.hbm [shape: f32[8,32], index: 1, kind: input, shape index: {}]   ;;  %s441_s2 = inlined_call_operand.hbm [shape: f32[8,64], index: 2, kind: input, shape index: {}]   ;;  %s442_s3 = inlined_call_operand.hbm [shape: f32[32,32], index: 3, kind: input, shape index: {}]   ;;  %s443_s4 = inlined_call_operand.hbm [shape: f32[32,64], index: 4, kind: input, shape index: {}]   ;;  %s444_s5 = inlined_call_operand.hbm [shape: f32[8,32], index: 5, kind: output, shape index: {}]  }
   0x1   :  { %11 = vsyncpa [#allocation3], 0 }
   0x2   :  { %12 = vsyncpa [#allocation8], 0 }
   0x3   :  { %13 = vsyncpa [#allocation11], 0  ;;  %s40_s20 = sshll.u32 %s441_s2, 4  ;;  %s41_s20 = int_to_ptr.hbm [resolvable:$true] %s40_s20 }
   0x4   :  { %14 = vsyncpa [#allocation4], 0  ;;  %s372_s21 = smov [#allocation7]   ;;  %s20_s25 = sshll.u32 %s439_s0, 4  ;;  %s21_s25 = int_to_ptr.hbm [resolvable:$true] %s20_s25 }
   0x5   :  { %s42_s22 = sshll.u32 %s372_s21, 4  ;;  %s373_s26 = smov [#allocation2]   ;;  %s43_s22 = int_to_ptr.vmem [resolvable:$true] %s42_s22 }
   0x6   :  { %45 = dma.hbm_to_vmem [thread:$0]  %s41_s20, 128, %s43_s22, [#allocation8]  }
   0x7   :  { %23 = dma.hbm_to_smem %s21_s25, 16, %s373_s26, [#allocation5]  }
   0x8   :  { %s29_s29 = sshll.u32 %s440_s1, 4  ;;  %s374_s30 = smov [#allocation6]   ;;  %s30_s29 = int_to_ptr.hbm [resolvable:$true] %s29_s29 }
   0x9   :  { %s31_s2 = sshll.u32 %s374_s30, 4  ;;  %s50_s8 = sshll.u32 %s442_s3, 4  ;;  %s32_s2 = int_to_ptr.vmem [resolvable:$true] %s31_s2  ;;  %s51_s8 = int_to_ptr.hbm [resolvable:$true] %s50_s8 }
   0xa   :  { %34 = dma.hbm_to_vmem [thread:$0]  %s30_s29, 128, %s32_s2, [#allocation3]  }
   0xb   :  { %s375_s9 = smov [#allocation9]   ;;  %s376_s10 = smov 128  }
   0xc   :  { %s52_s0 = sshll.u32 %s375_s9, 4  ;;  %s377_s11 = smov 8   ;;  %s53_s0 = int_to_ptr.vmem [resolvable:$true] %s52_s0 }
   0xd   :  { %58 = dma.hbm_to_vmem [thread:$0]  %s51_s8, 512, %s53_s0, [#allocation8], %s376_s10, %s376_s10, %s377_s11  }
   0xe   :  { %s63_s1 = sshll.u32 %s443_s4, 4  ;;  %s378_s14 = smov [#allocation10]   ;;  %s64_s1 = int_to_ptr.hbm [resolvable:$true] %s63_s1 }
   0xf   :  { %s65_s15 = sshll.u32 %s378_s14, 4  ;;  %s66_s15 = int_to_ptr.vmem [resolvable:$true] %s65_s15 }
  0x10   :  { %71 = dma.hbm_to_vmem [thread:$0]  %s64_s1, 512, %s66_s15, [#allocation11], %s376_s10, %s376_s10, %s377_s11  }
  0x11   :  { %362 = dma.done.wait [#allocation5], 16  }
  0x12   :  { %363 = vsyncadd [#allocation5], 4294967280 }
  0x13   :  { %364 = dma.done.wait [#allocation3], 128  }
  0x14   :  { %365 = vsyncadd [#allocation3], 4294967168 }
  0x15   :  { %366 = dma.done.wait [#allocation8], 640  }
  0x16   :  { %367 = vsyncadd [#allocation8], 4294966656 }
  0x17   :  { %368 = dma.done.wait [#allocation11], 512  }
  0x18   :  { %369 = vsyncadd [#allocation11], 4294966784 }
  0x19   :  { %92 = sfence }
  0x1a   :  { %v100_v0 = vld [vmem:[#allocation9 + $0x18] sm:$0xff]  ;;  %vm143_vm0 = vcmask 261120   ;;  %vm105_vm1 = vcmask 523264   ;;  %v99_v2 = vld [vmem:[#allocation9 + $0x10] sm:$0xff]  ;;  %v98_v4 = vld [vmem:[#allocation9 + $0x8] sm:$0xff]  ;;  %s209_s3 = sld [smem:[#allocation2 + $0x1]] }
  0x1b   :  { %215 = vmatpush.xpose.msk.msra.mxu1 %vm143_vm0, %v100_v0  ;;  %v104_v1 = vld [vmem:[#allocation10 + $0x18] sm:$0xff]  ;;  %v103_v3 = vld [vmem:[#allocation10 + $0x10] sm:$0xff]  ;;  %v102_v5 = vld [vmem:[#allocation10 + $0x8] sm:$0xff]  ;;  %s93_s4 = sld [smem:[#allocation2]]  ;;  %s379_s17 = smov [#allocation12]  }
  0x1c   :  { %210 = vmatpush.xpose.msk.msra.mxu0 %vm105_vm1, %v104_v1  ;;  %v97_v6 = vld [vmem:[#allocation9] sm:$0xff]  ;;  %v95_v8 = vld [vmem:[#allocation6] sm:$0xff]  ;;  %v96_v9 = vld [vmem:[#allocation7] sm:$0xff]  ;;  %s194_s18 = sshll.u32 %s379_s17, 4  ;;  %s196_s21 = sshll.u32 %s444_s5, 4  ;;  %s195_s18 = int_to_ptr.vmem [resolvable:$true] %s194_s18  ;;  %s197_s21 = int_to_ptr.hbm [resolvable:$true] %s196_s21 }
  0x1d   :  { %v101_v7 = vld [vmem:[#allocation10] sm:$0xff] }
  0x1f   :  { %216 = vmatpush.xpose.msk.msra.mxu1 %vm143_vm0, %v99_v2 }
  0x20   :  { %211 = vmatpush.xpose.msk.msra.mxu0 %vm105_vm1, %v103_v3  ;;  %v141_v10 = vstv %s209_s3 }
  0x21   :  { %s179_s16 = sadd.f32 1.1920929e-07, %s93_s4  ;;  %v142_v11 = vmul.f32 %v141_v10, %v95_v8 }
  0x23   :  { %217 = vmatpush.xpose.msk.msra.mxu1 %vm143_vm0, %v98_v4  ;;  %v180_v13 = vstv %s179_s16 }
  0x24   :  { %212 = vmatpush.xpose.msk.msra.mxu0 %vm105_vm1, %v102_v5 }
  0x27   :  { %218 = vmatpush.xpose.msk.msra.mxu1 %vm143_vm0, %v97_v6 }
  0x28   :  { %213 = vmatpush.xpose.msk.msra.mxu0 %vm105_vm1, %v101_v7 }
  0x2a   :  { %219 = vmatmul.msk.f32.vlgmr.msra.gmra.mxu1 %vm143_vm0, %v95_v8 }
  0x2b   :  { %214 = vmatmul.msk.f32.vlgmr.msra.gmra.mxu0 %vm105_vm1, %v96_v9 }
  0xa7   :  { %v176_v12 = vpop.f32.mrf.mxu1 }
  0xa8   :  { %v177_v14 = vadd.f32 %v176_v12, %v142_v11  ;;  %v138_v19 = vpop.f32.mrf.mxu0 }
  0xaa   :  { %v181_v15 = vadd.f32 %v180_v13, %v177_v14 }
  0xac   :  { %228 = vrcp.f32 %v181_v15 }
  0xb2   :  { %v229_v16 = vpop.eup %228 }
  0xb3   :  { %v183_v17 = vmul.f32 %v229_v16, %v181_v15 }
  0xb5   :  { %v184_v18 = vsub.f32 2.0, %v183_v17 }
  0xb7   :  { %v185_v20 = vmul.f32 %v229_v16, %v184_v18 }
  0xb9   :  { %v186_v21 = vmul.f32 %v185_v20, %v138_v19 }
  0xbb   :  { %v187_v22 = vmul.f32 %v186_v21, %v95_v8 }
  0xbd   :  { %188 = vst.msk [vmem:[#allocation12] sm:$0xff] %vm143_vm0, %v187_v22 }
  0xbe   :  { %199 = dma.vmem_to_hbm [thread:$0]  %s195_s18, 128, %s197_s21, [#allocation4]  }
  0xbf   :  { %370 = dma.done.wait [#allocation4], 128  }
  0xc0   :  { %371 = vsyncadd [#allocation4], 4294967168 }
  0xc1   :  { %204 = vsyncpa [#allocation3], 1 }
  0xc2   :  { %205 = vsyncpa [#allocation8], 1 }
  0xc3   :  { %206 = vsyncpa [#allocation11], 1 }
  0xc4   :  { %207 = vsyncpa [#allocation4], 1 }
  0xc5   :  { %208 = vsyncpa [#allocation5], 1 }

</bundles_post_ra>
